<compile_context>
chip_gen: v5e
topology: v5e:2x2
jax: 0.10.0
libtpu: 0.0.40
codegen_flags: <defaults>
</compile_context>

<pallas_src>
import functools
import math

import jax
import jax.numpy as jnp
import numpy as np
from jax.experimental import pallas as pl
from jax.experimental.pallas import tpu as pltpu

NEG_SLOPE = 0.2      # GATv2Conv default negative_slope
NEG_BIG = -1e30      # additive mask for non-edges (finite: avoids inf-inf NaNs)


def _round_up(a, b):
    return ((a + b - 1) // b) * b


# --------------------------------------------------------------------------- #
# Kernel 1: fused input projections + rank-1 scoring precompute.               #
# --------------------------------------------------------------------------- #
def _proj_kernel(x_ref, w_ref, b_ref, abd_ref, abdt_ref,
                 xl_ref, xr_ref, xlt_ref, slt_ref, sr_ref, *, hc):
    # One MXU matmul for both projections: w = [W_l | W_r] -> [TILE_N, 2*H*C].
    xlr = jnp.dot(x_ref[...], w_ref[...],
                  preferred_element_type=jnp.float32) + b_ref[...]
    xl = xlr[:, :hc]
    xr = xlr[:, hc:]
    xl_ref[...] = xl
    xr_ref[...] = xr
    xlt = xl.T                      # source features lane-dense for pairwise scoring
    xlt_ref[...] = xlt
    # Rank-1 scoring terms, pre-scaled by the leaky-relu negative slope:
    #   sr[i,h]  = slope * att[h,:] . x_r[i,h,:]
    #   slt[h,j] = slope * att[h,:] . x_l[j,h,:]
    sr_ref[...] = jnp.dot(xr, abd_ref[...], preferred_element_type=jnp.float32)
    slt_ref[...] = jnp.dot(abdt_ref[...], xlt, preferred_element_type=jnp.float32)


# --------------------------------------------------------------------------- #
# Kernel 2: block-sparse tiled GATv2 attention + aggregation, online softmax.  #
# --------------------------------------------------------------------------- #
def _attn_kernel(tab_ref, cnt_ref, att_ref, xr_ref, sr_ref, xl_ref, xlt_ref,
                 slt_ref, adj_ref, bias_ref, out_ref, ml_scr, acc_scr,
                 *, heads, ch, scoring_dtype):
    d_idx = pl.program_id(0)
    s_idx = pl.program_id(1)
    td = ml_scr.shape[0]

    @pl.when(s_idx == 0)
    def _init():
        # Merged scratch: [:, :H] running max, [:, H:] running denominator.
        ml_scr[...] = jnp.concatenate(
            [jnp.full((td, heads), NEG_BIG, jnp.float32),
             jnp.zeros((td, heads), jnp.float32)], axis=1)
        acc_scr[...] = jnp.zeros_like(acc_scr)

    # Block-CSR skip: only the first cnt[d] src steps carry real adjacency blocks.
    @pl.when(s_idx < cnt_ref[d_idx])
    def _compute():
        xr = xr_ref[...].astype(scoring_dtype)     # [TD, H*C] destination features
        xlt = xlt_ref[...].astype(scoring_dtype)   # [H*C, TS] source features^T
        xl = xl_ref[...]                           # [TS, H*C] source features
        sr = sr_ref[...]                           # [TD, H]   slope*att.x_r
        slt = slt_ref[...]                         # [H, TS]   slope*att.x_l
        mask = adj_ref[...] > 0                    # [TD, TS]  int8 adjacency tile

        ml = ml_scr[...]
        m_prev = ml[:, :heads]
        l_prev = ml[:, heads:]
        acc_prev = acc_scr[...]
        xl_mm = xl.astype(scoring_dtype)

        m_parts, l_parts, acc_parts = [], [], []
        for h in range(heads):                     # H, C small -> static unroll
            lo = h * ch
            # leaky(t) = slope*t + (1-slope)*relu(t); slope*sum_c att*t is the
            # rank-1 (sr+slt) term, (1-slope)*att is folded into att_ref, so the
            # inner loop is add / max / mul-add per channel (lane-dense [TD,TS]).
            rsum = jnp.zeros(mask.shape, scoring_dtype)
            for c in range(ch):
                a_hc = att_ref[h, c].astype(scoring_dtype)          # SMEM scalar
                t = xr[:, lo + c:lo + c + 1] + xlt[lo + c:lo + c + 1, :]
                rsum = rsum + jnp.maximum(t, 0) * a_hc
            logits = rsum.astype(jnp.float32) + sr[:, h:h + 1] + slt[h:h + 1, :]
            logits = jnp.where(mask, logits, NEG_BIG)

            # Flash-style online softmax across source tiles.
            m_h = m_prev[:, h:h + 1]
            m_new = jnp.maximum(m_h, jnp.max(logits, axis=1, keepdims=True))
            corr = jnp.exp(m_h - m_new)
            p = jnp.where(mask, jnp.exp(logits - m_new), 0.0)   # exact zeros off-graph
            m_parts.append(m_new)
            l_parts.append(corr * l_prev[:, h:h + 1]
                           + jnp.sum(p, axis=1, keepdims=True))
            acc_parts.append(corr * acc_prev[:, lo:lo + ch]
                             + jnp.dot(p.astype(scoring_dtype),
                                       xl_mm[:, lo:lo + ch],
                                       preferred_element_type=jnp.float32))

        # One store per scratch per step.
        ml_scr[...] = jnp.concatenate(m_parts + l_parts, axis=1)
        acc_scr[...] = jnp.concatenate(acc_parts, axis=1)

    @pl.when(s_idx == pl.num_programs(1) - 1)
    def _finalize():
        l = ml_scr[...][:, heads:]
        l_safe = jnp.where(l > 0, l, 1.0)          # zero in-degree -> bias only
        inv = pl.reciprocal(l_safe, approx=True)   # EUP slot
        inv = inv * (2.0 - l_safe * inv)           # one Newton step -> ~f32 accuracy
        acc = acc_scr[...]
        pieces = [acc[:, h * ch:(h + 1) * ch] * inv[:, h:h + 1]
                  for h in range(heads)]
        out = jnp.concatenate(pieces, axis=1) + bias_ref[...]
        out_ref[...] = out.astype(out_ref.dtype)   # single lane-dense store


def gatv2_conv_thr_forward(x, edge_index, params, *, heads, ch,
                           tile_dst=None, tile_src=None,
                           scoring_dtype=jnp.float32):
    """Returns (out, edge_index) like GATv2ConvThr.forward (scheme_a='full')."""
    n, f_in = x.shape
    wl, bl, wr, br, att, bias = params
    hc = heads * ch

    # ---- tiling (multiples of 128 keep every attention block lane-dense) -----
    n128 = _round_up(n, 128)
    if tile_src is None:
        tile_src = min(1024, n128)
    if tile_dst is None:
        tile_dst = min(512, n128)
        # v7x megacore: keep >= 2 destination tiles once the graph is big enough.
        if n128 // tile_dst < 2 and n128 >= 256:
            tile_dst = max(128, (n128 // 2) // 128 * 128)
    n_pad = _round_up(n, math.lcm(tile_dst, tile_src))
    tile_n = math.lcm(tile_dst, tile_src)       # projection row tile, divides n_pad
    n_dst_t, n_src_t = n_pad // tile_dst, n_pad // tile_src

    try:                                        # VMEM budget per chip generation
        vmem_cap = int(pltpu.get_tpu_info().vmem_capacity_bytes)
    except Exception:
        vmem_cap = 128 * 1024 * 1024
    vmem_limit = min(96 * 1024 * 1024, (vmem_cap * 3) // 4)   # ~48 MiB on v7x

    x_p = x if n_pad == n else jnp.pad(x, ((0, n_pad - n), (0, 0)))
    src, dst = edge_index[0], edge_index[1]
    # int8 dense adjacency: adj[dst, src] = 1 iff edge src -> dst.  Padded
    # rows/cols stay 0 and are masked out inside the kernel.
    adj = jnp.zeros((n_pad, n_pad), jnp.int8).at[dst, src].set(1)

    # Block-CSR skip table: per dst tile, non-empty src tiles first (ascending),
    # padding entries repeat the last valid tile (no re-DMA); `counts` gates compute.
    occ = jnp.zeros((n_dst_t, n_src_t), jnp.bool_).at[
        dst // tile_dst, src // tile_src].set(True)
    counts = jnp.sum(occ, axis=1).astype(jnp.int32)
    pos = jnp.arange(n_src_t, dtype=jnp.int32)
    order = jnp.argsort(jnp.where(occ, pos[None, :], n_src_t + pos[None, :]),
                        axis=1).astype(jnp.int32)
    last = jnp.take_along_axis(order, jnp.maximum(counts - 1, 0)[:, None], axis=1)
    srctab = jnp.where(pos[None, :] < counts[:, None], order, last).reshape(-1)

    # Fused projection weights + block-diagonal att matrices for the rank-1 terms.
    w_lr = jnp.concatenate([wl, wr], axis=1)
    b_lr = jnp.concatenate([bl, br], axis=1)
    att_bd = jnp.zeros((hc, heads), jnp.float32).at[
        jnp.arange(hc), jnp.repeat(jnp.arange(heads), ch)].set(
        NEG_SLOPE * att.reshape(-1))
    att_bd_t = att_bd.T
    att_scaled = (1.0 - NEG_SLOPE) * att        # (1-slope) folded into the SMEM table

    # ---- kernel 1: projections + scoring precompute (once per graph) ---------
    xl, xr, xlt, slt, sr = pl.pallas_call(
        functools.partial(_proj_kernel, hc=hc),
        grid_spec=pltpu.PrefetchScalarGridSpec(
            num_scalar_prefetch=0,
            grid=(n_pad // tile_n,),
            in_specs=[
                pl.BlockSpec((tile_n, f_in), lambda i: (i, 0)),
                pl.BlockSpec((f_in, 2 * hc), lambda i: (0, 0)),
                pl.BlockSpec((1, 2 * hc), lambda i: (0, 0)),
                pl.BlockSpec((hc, heads), lambda i: (0, 0)),
                pl.BlockSpec((heads, hc), lambda i: (0, 0)),
            ],
            out_specs=[
                pl.BlockSpec((tile_n, hc), lambda i: (i, 0)),
                pl.BlockSpec((tile_n, hc), lambda i: (i, 0)),
                pl.BlockSpec((hc, tile_n), lambda i: (0, i)),
                pl.BlockSpec((heads, tile_n), lambda i: (0, i)),
                pl.BlockSpec((tile_n, heads), lambda i: (i, 0)),
            ],
        ),
        out_shape=[
            jax.ShapeDtypeStruct((n_pad, hc), jnp.float32),
            jax.ShapeDtypeStruct((n_pad, hc), jnp.float32),
            jax.ShapeDtypeStruct((hc, n_pad), jnp.float32),
            jax.ShapeDtypeStruct((heads, n_pad), jnp.float32),
            jax.ShapeDtypeStruct((n_pad, heads), jnp.float32),
        ],
        compiler_params=pltpu.CompilerParams(
            dimension_semantics=("parallel",),
            vmem_limit_bytes=vmem_limit),
    )(x_p, w_lr, b_lr, att_bd, att_bd_t)

    # ---- kernel 2: attention + aggregation ------------------------------------
    grid = (n_dst_t, n_src_t)
    cost = pl.CostEstimate(
        flops=int(2 * n_pad * f_in * 2 * hc          # projections
                  + 4 * hc * n_pad * n_pad           # pairwise scoring (dense bound)
                  + 2 * hc * n_pad * n_pad),         # aggregation matmuls
        transcendentals=int(heads * n_pad * n_pad),
        bytes_accessed=int(n_pad * n_pad                         # int8 adjacency
                           + n_dst_t * 3 * n_pad * hc * 4        # x_l/x_l^T re-reads
                           + 2 * n_pad * hc * 4),                # x_r + out
    )

    s_total = n_src_t

    def _src(d, s, tab):
        return tab[d * s_total + s]

    out = pl.pallas_call(
        functools.partial(_attn_kernel, heads=heads, ch=ch,
                          scoring_dtype=scoring_dtype),
        grid_spec=pltpu.PrefetchScalarGridSpec(
            num_scalar_prefetch=2,                   # srctab, counts (SMEM)
            grid=grid,
            in_specs=[
                pl.BlockSpec(memory_space=pltpu.MemorySpace.SMEM),        # att (scaled)
                pl.BlockSpec((tile_dst, hc), lambda d, s, tab, cnt: (d, 0)),      # x_r
                pl.BlockSpec((tile_dst, heads), lambda d, s, tab, cnt: (d, 0)),   # s_r
                pl.BlockSpec((tile_src, hc),
                             lambda d, s, tab, cnt: (_src(d, s, tab), 0)),        # x_l
                pl.BlockSpec((hc, tile_src),
                             lambda d, s, tab, cnt: (0, _src(d, s, tab))),        # x_l^T
                pl.BlockSpec((heads, tile_src),
                             lambda d, s, tab, cnt: (0, _src(d, s, tab))),        # s_l^T
                pl.BlockSpec((tile_dst, tile_src),
                             lambda d, s, tab, cnt: (d, _src(d, s, tab))),        # adj
                pl.BlockSpec((1, hc), lambda d, s, tab, cnt: (0, 0)),             # bias
            ],
            out_specs=pl.BlockSpec((tile_dst, hc), lambda d, s, tab, cnt: (d, 0)),
            scratch_shapes=[
                pltpu.VMEM((tile_dst, 2 * heads), jnp.float32),   # merged [max|denom]
                pltpu.VMEM((tile_dst, hc), jnp.float32),          # running accumulator
            ],
        ),
        out_shape=jax.ShapeDtypeStruct((n_pad, hc), jnp.float32),
        compiler_params=pltpu.CompilerParams(
            dimension_semantics=("parallel", "arbitrary"),
            vmem_limit_bytes=vmem_limit),
        cost_estimate=cost,
    )(srctab, counts, att_scaled, xr, sr, xl, xlt, slt, adj, bias)

    return out[:n], edge_index


# --------------------------------------------------------------------------- #
# Pure-JAX edge-list reference matching the PyTorch/PyG semantics.             #
# --------------------------------------------------------------------------- #
def _reference(x, edge_index, params, *, heads, ch):
    n = x.shape[0]
    wl, bl, wr, br, att, bias = params
    src, dst = edge_index[0], edge_index[1]
    xl = (x @ wl + bl).reshape(n, heads, ch)
    xr = (x @ wr + br).reshape(n, heads, ch)
    x_j = xl[src]
    x_i = xr[dst]
    s = x_i + x_j
    s = jnp.where(s > 0, s, NEG_SLOPE * s)
    logits = jnp.sum(s * att[None], axis=-1)     # [m, H]
    m_seg = jax.ops.segment_max(logits, dst, num_segments=n)
    p = jnp.exp(logits - m_seg[dst])
    denom = jax.ops.segment_sum(p, dst, num_segments=n)
    alpha = p / denom[dst]
    out = jax.ops.segment_sum(x_j * alpha[..., None], dst, num_segments=n)
    return out.reshape(n, heads * ch) + bias[0]


def _make_edges(n, offsets):
    src, dst = [], []
    for i in range(n):
        for d in offsets:
            src.append((i + d) % n)
            dst.append(i)
    return jnp.array([src, dst], dtype=jnp.int32)


def _make_params(key, f_in, heads, c):
    ks = jax.random.split(key, 4)
    glorot = math.sqrt(6.0 / (f_in + heads * c))
    wl = jax.random.uniform(ks[0], (f_in, heads * c), jnp.float32, -glorot, glorot)
    wr = jax.random.uniform(ks[1], (f_in, heads * c), jnp.float32, -glorot, glorot)
    bl = jnp.zeros((1, heads * c), jnp.float32)
    br = jnp.zeros((1, heads * c), jnp.float32)
    att = jax.random.uniform(ks[2], (heads, c), jnp.float32, -glorot, glorot)
    bias = jax.random.normal(ks[3], (1, heads * c), jnp.float32) * 0.1
    return wl, bl, wr, br, att, bias


if __name__ == "__main__":
    HEADS, OUT_CH, F_IN = 4, 32, 8      # depth>0 -> concat=True, C = OUT_CH // HEADS
    C = OUT_CH // HEADS
    key = jax.random.PRNGKey(0)
    kp, kx1, kx2, kx3 = jax.random.split(key, 4)
    params = _make_params(kp, F_IN, HEADS, C)

    # --- test 1: small graph, single tile (grid 1x1) -------------------------
    N1 = 16
    x1 = jax.random.normal(kx1, (N1, F_IN), jnp.float32)
    ei1 = _make_edges(N1, (0, 1, 3, 7))                 # duplicate-free, self-loops
    out1, ei_out1 = gatv2_conv_thr_forward(x1, ei1, params, heads=HEADS, ch=C)
    out1 = jax.block_until_ready(out1)
    ref1 = _reference(x1, ei1, params, heads=HEADS, ch=C)
    np.testing.assert_allclose(np.asarray(out1), np.asarray(ref1),
                               rtol=1e-4, atol=1e-4)
    assert out1.shape == (N1, HEADS * C) and ei_out1.shape == ei1.shape

    # --- test 2: tiled grid, full block occupancy, online-softmax reduction --
    N2 = 320
    x2 = jax.random.normal(kx2, (N2, F_IN), jnp.float32)
    ei2 = _make_edges(N2, (0, 1, 5, 17, 63, 131))       # duplicate-free, self-loops
    out2, ei_out2 = gatv2_conv_thr_forward(x2, ei2, params, heads=HEADS, ch=C,
                                           tile_dst=128, tile_src=128)
    out2 = jax.block_until_ready(out2)
    ref2 = _reference(x2, ei2, params, heads=HEADS, ch=C)
    np.testing.assert_allclose(np.asarray(out2), np.asarray(ref2),
                               rtol=2e-4, atol=2e-4)
    assert out2.shape == (N2, HEADS * C) and ei_out2.shape == ei2.shape

    # --- test 3: sparse block occupancy -> exercises the block-CSR skip path -
    N3 = 320
    x3 = jax.random.normal(kx3, (N3, F_IN), jnp.float32)
    ei3 = _make_edges(N3, (0, 1, 2, 5, 9))              # local graph, empty blocks
    out3, _ = gatv2_conv_thr_forward(x3, ei3, params, heads=HEADS, ch=C,
                                     tile_dst=128, tile_src=128)
    out3 = jax.block_until_ready(out3)
    ref3 = _reference(x3, ei3, params, heads=HEADS, ch=C)
    np.testing.assert_allclose(np.asarray(out3), np.asarray(ref3),
                               rtol=2e-4, atol=2e-4)

    print("KERNEL_OK")
</pallas_src>

<mosaic_0001>
module attributes {stable_mosaic.version = 11 : i64} {
  func.func @_proj_kernel(%arg0: i32, %arg1: memref<128x8xf32, #tpu.memory_space<vmem>>, %arg2: memref<8x64xf32, #tpu.memory_space<vmem>>, %arg3: memref<1x64xf32, #tpu.memory_space<vmem>>, %arg4: memref<32x4xf32, #tpu.memory_space<vmem>>, %arg5: memref<4x32xf32, #tpu.memory_space<vmem>>, %arg6: memref<128x32xf32, #tpu.memory_space<vmem>>, %arg7: memref<128x32xf32, #tpu.memory_space<vmem>>, %arg8: memref<32x128xf32, #tpu.memory_space<vmem>>, %arg9: memref<4x128xf32, #tpu.memory_space<vmem>>, %arg10: memref<128x4xf32, #tpu.memory_space<vmem>>) attributes {dimension_semantics = [#tpu.dimension_semantics<parallel>], iteration_bounds = array<i64: 1>, scalar_prefetch = 0 : i64, scratch_operands = 0 : i64, tpu.core_type = #tpu.core_type<tc>, window_params = [{transform_indices = @transform_0, window_bounds = array<i64: 128, 8>}, {pipeline_mode = #tpu.pipeline_mode<synchronous>, transform_indices = @transform_1, window_bounds = array<i64: 8, 64>}, {pipeline_mode = #tpu.pipeline_mode<synchronous>, transform_indices = @transform_2, window_bounds = array<i64: 1, 64>}, {pipeline_mode = #tpu.pipeline_mode<synchronous>, transform_indices = @transform_3, window_bounds = array<i64: 32, 4>}, {pipeline_mode = #tpu.pipeline_mode<synchronous>, transform_indices = @transform_4, window_bounds = array<i64: 4, 32>}, {transform_indices = @transform_5, window_bounds = array<i64: 128, 32>}, {transform_indices = @transform_6, window_bounds = array<i64: 128, 32>}, {transform_indices = @transform_7, window_bounds = array<i64: 32, 128>}, {transform_indices = @transform_8, window_bounds = array<i64: 4, 128>}, {transform_indices = @transform_9, window_bounds = array<i64: 128, 4>}]} {
    %c0 = arith.constant 0 : index
    %c0_0 = arith.constant 0 : index
    %0 = vector.load %arg1[%c0, %c0_0] : memref<128x8xf32, #tpu.memory_space<vmem>>, vector<128x8xf32>
    %c0_1 = arith.constant 0 : index
    %c0_2 = arith.constant 0 : index
    %1 = vector.load %arg2[%c0_1, %c0_2] : memref<8x64xf32, #tpu.memory_space<vmem>>, vector<8x64xf32>
    %cst = arith.constant dense<0.000000e+00> : vector<128x64xf32>
    %2 = tpu.matmul %0, %1, %cst {dimension_numbers = #tpu.dot_dimension_numbers<[1], [0], [0], [1], [0, 0, 1, 1], [], []>} : vector<128x8xf32>, vector<8x64xf32>, vector<128x64xf32> -> vector<128x64xf32>
    %c0_3 = arith.constant 0 : index
    %c0_4 = arith.constant 0 : index
    %3 = vector.load %arg3[%c0_3, %c0_4] : memref<1x64xf32, #tpu.memory_space<vmem>>, vector<1x64xf32>
    %4 = vector.broadcast %3 : vector<1x64xf32> to vector<128x64xf32>
    %5 = arith.addf %2, %4 : vector<128x64xf32>
    %6 = vector.extract_strided_slice %5 {offsets = [0, 0], sizes = [128, 32], strides = [1, 1]} : vector<128x64xf32> to vector<128x32xf32>
    %7 = vector.extract_strided_slice %5 {offsets = [0, 32], sizes = [128, 32], strides = [1, 1]} : vector<128x64xf32> to vector<128x32xf32>
    %c0_5 = arith.constant 0 : index
    %c0_6 = arith.constant 0 : index
    %8 = vector.load %arg6[%c0_5, %c0_6] : memref<128x32xf32, #tpu.memory_space<vmem>>, vector<128x32xf32>
    tpu.vector_store %arg6[%c0_5, %c0_6], %6 {strides = array<i32>} : memref<128x32xf32, #tpu.memory_space<vmem>>, vector<128x32xf32>,
    %c0_7 = arith.constant 0 : index
    %c0_8 = arith.constant 0 : index
    %9 = vector.load %arg7[%c0_7, %c0_8] : memref<128x32xf32, #tpu.memory_space<vmem>>, vector<128x32xf32>
    tpu.vector_store %arg7[%c0_7, %c0_8], %7 {strides = array<i32>} : memref<128x32xf32, #tpu.memory_space<vmem>>, vector<128x32xf32>,
    %10 = tpu.transpose %6, [1, 0] : vector<128x32xf32> -> vector<32x128xf32>
    %c0_9 = arith.constant 0 : index
    %c0_10 = arith.constant 0 : index
    %11 = vector.load %arg8[%c0_9, %c0_10] : memref<32x128xf32, #tpu.memory_space<vmem>>, vector<32x128xf32>
    tpu.vector_store %arg8[%c0_9, %c0_10], %10 {strides = array<i32>} : memref<32x128xf32, #tpu.memory_space<vmem>>, vector<32x128xf32>,
    %c0_11 = arith.constant 0 : index
    %c0_12 = arith.constant 0 : index
    %12 = vector.load %arg4[%c0_11, %c0_12] : memref<32x4xf32, #tpu.memory_space<vmem>>, vector<32x4xf32>
    %cst_13 = arith.constant dense<0.000000e+00> : vector<128x4xf32>
    %13 = tpu.matmul %7, %12, %cst_13 {dimension_numbers = #tpu.dot_dimension_numbers<[1], [0], [0], [1], [0, 0, 1, 1], [], []>} : vector<128x32xf32>, vector<32x4xf32>, vector<128x4xf32> -> vector<128x4xf32>
    %c0_14 = arith.constant 0 : index
    %c0_15 = arith.constant 0 : index
    %14 = vector.load %arg10[%c0_14, %c0_15] : memref<128x4xf32, #tpu.memory_space<vmem>>, vector<128x4xf32>
    tpu.vector_store %arg10[%c0_14, %c0_15], %13 {strides = array<i32>} : memref<128x4xf32, #tpu.memory_space<vmem>>, vector<128x4xf32>,
    %c0_16 = arith.constant 0 : index
    %c0_17 = arith.constant 0 : index
    %15 = vector.load %arg5[%c0_16, %c0_17] : memref<4x32xf32, #tpu.memory_space<vmem>>, vector<4x32xf32>
    %cst_18 = arith.constant dense<0.000000e+00> : vector<4x128xf32>
    %16 = tpu.matmul %15, %10, %cst_18 {dimension_numbers = #tpu.dot_dimension_numbers<[1], [0], [0], [1], [0, 0, 1, 1], [], []>} : vector<4x32xf32>, vector<32x128xf32>, vector<4x128xf32> -> vector<4x128xf32>
    %c0_19 = arith.constant 0 : index
    %c0_20 = arith.constant 0 : index
    %17 = vector.load %arg9[%c0_19, %c0_20] : memref<4x128xf32, #tpu.memory_space<vmem>>, vector<4x128xf32>
    tpu.vector_store %arg9[%c0_19, %c0_20], %16 {strides = array<i32>} : memref<4x128xf32, #tpu.memory_space<vmem>>, vector<4x128xf32>,
    return
  }
  func.func @transform_0(%arg0: i32) -> (i32, i32) {
    %c0_i32 = arith.constant 0 : i32
    %c0_i32_0 = arith.constant 0 : i32
    return %arg0, %c0_i32 : i32, i32
  }
  func.func @transform_1(%arg0: i32) -> (i32, i32) {
    %c0_i32 = arith.constant 0 : i32
    %c0_i32_0 = arith.constant 0 : i32
    %c0_i32_1 = arith.constant 0 : i32
    return %c0_i32, %c0_i32_0 : i32, i32
  }
  func.func @transform_2(%arg0: i32) -> (i32, i32) {
    %c0_i32 = arith.constant 0 : i32
    %c0_i32_0 = arith.constant 0 : i32
    %c0_i32_1 = arith.constant 0 : i32
    return %c0_i32, %c0_i32_0 : i32, i32
  }
  func.func @transform_3(%arg0: i32) -> (i32, i32) {
    %c0_i32 = arith.constant 0 : i32
    %c0_i32_0 = arith.constant 0 : i32
    %c0_i32_1 = arith.constant 0 : i32
    return %c0_i32, %c0_i32_0 : i32, i32
  }
  func.func @transform_4(%arg0: i32) -> (i32, i32) {
    %c0_i32 = arith.constant 0 : i32
    %c0_i32_0 = arith.constant 0 : i32
    %c0_i32_1 = arith.constant 0 : i32
    return %c0_i32, %c0_i32_0 : i32, i32
  }
  func.func @transform_5(%arg0: i32) -> (i32, i32) {
    %c0_i32 = arith.constant 0 : i32
    %c0_i32_0 = arith.constant 0 : i32
    return %arg0, %c0_i32 : i32, i32
  }
  func.func @transform_6(%arg0: i32) -> (i32, i32) {
    %c0_i32 = arith.constant 0 : i32
    %c0_i32_0 = arith.constant 0 : i32
    return %arg0, %c0_i32 : i32, i32
  }
  func.func @transform_7(%arg0: i32) -> (i32, i32) {
    %c0_i32 = arith.constant 0 : i32
    %c0_i32_0 = arith.constant 0 : i32
    return %c0_i32, %arg0 : i32, i32
  }
  func.func @transform_8(%arg0: i32) -> (i32, i32) {
    %c0_i32 = arith.constant 0 : i32
    %c0_i32_0 = arith.constant 0 : i32
    return %c0_i32, %arg0 : i32, i32
  }
  func.func @transform_9(%arg0: i32) -> (i32, i32) {
    %c0_i32 = arith.constant 0 : i32
    %c0_i32_0 = arith.constant 0 : i32
    return %arg0, %c0_i32 : i32, i32
  }
}

</mosaic_0001>

<bundles_post_ra>
// kernel: tpu_custom_call.1
= control target key start
LH: loop header
LB: loop body
LE: loop exit
PB: predicated region body
PF: predicated region fallthrough
CT: control target
= control target key end

     0   :  { %15 = vsyncpa [#allocation3], 0  ;;  %vm48_vm0 = vcmask 64512   ;;  %s999_s0 = inlined_call_operand.vmem [shape: f32[128,8], index: 0, kind: input, shape index: {}]   ;;  %s1000_s1 = inlined_call_operand.vmem [shape: f32[8,64], index: 1, kind: input, shape index: {}]   ;;  %s1001_s2 = inlined_call_operand.vmem [shape: f32[1,64], index: 2, kind: input, shape index: {}]   ;;  %s1002_s3 = inlined_call_operand.vmem [shape: f32[32,4], index: 3, kind: input, shape index: {}]   ;;  %s1003_s4 = inlined_call_operand.vmem [shape: f32[4,32], index: 4, kind: input, shape index: {}]   ;;  %s1004_s5 = inlined_call_operand.vmem [shape: f32[128,32], index: 5, kind: output, shape index: {0}]   ;;  %s1005_s6 = inlined_call_operand.vmem [shape: f32[128,32], index: 6, kind: output, shape index: {1}]   ;;  %s1006_s7 = inlined_call_operand.hbm [shape: f32[32,128], index: 7, kind: output, shape index: {2}]   ;;  %s1007_s8 = inlined_call_operand.hbm [shape: f32[4,128], index: 8, kind: output, shape index: {3}]   ;;  %s1008_s9 = inlined_call_operand.vmem [shape: f32[128,4], index: 9, kind: output, shape index: {4}]  }
   0x1   :  { %v43_v0 = vld [vmem:[%s1000_s1] sm:$0xff]  ;;  %v36_v2 = vld [vmem:[%s999_s0 + $0x48] sm:$0xff] }
   0x2   :  { %v27_v1 = vld [vmem:[%s999_s0] sm:$0xff]  ;;  %112 = vmatpush.msra.mxu0 %v43_v0  ;;  %517 = vmatpush.msra.mxu2 %v43_v0 }
   0x3   :  { %484 = vmatmul.msk.f32.vlgmr.msra.gmra.mxu0 %vm48_vm0, %v27_v1  ;;  %493 = vmatmul.msk.f32.vlgmr.msra.gmra.mxu2 %vm48_vm0, %v36_v2 }
   0x4   :  { %16 = vsyncpa [#allocation5], 0  ;;  %v28_v3 = vld [vmem:[%s999_s0 + $0x8] sm:$0xff]  ;;  %v37_v4 = vld [vmem:[%s999_s0 + $0x50] sm:$0xff]  ;;  %vm162_vm1 = vcmask 261120   ;;  %s581_s25 = smov [#allocation2]  }
   0x5   :  { %v29_v5 = vld [vmem:[%s999_s0 + $0x10] sm:$0xff]  ;;  %v38_v6 = vld [vmem:[%s999_s0 + $0x58] sm:$0xff]  ;;  %v39_v8 = vld [vmem:[%s999_s0 + $0x60] sm:$0xff]  ;;  %s448_s27 = sshll.u32 %s1006_s7, 4  ;;  %s582_s28 = smov 128   ;;  %vm396_vm2 = vcmask 31744   ;;  %s449_s27 = int_to_ptr.hbm [resolvable:$true] %s448_s27 }
   0x6   :  { %v30_v7 = vld [vmem:[%s999_s0 + $0x18] sm:$0xff]  ;;  %v31_v9 = vld [vmem:[%s999_s0 + $0x20] sm:$0xff]  ;;  %v40_v10 = vld [vmem:[%s999_s0 + $0x68] sm:$0xff]  ;;  %s583_s29 = smov 8   ;;  %s462_s13 = sshll.u32 %s1007_s8, 4  ;;  %s463_s13 = int_to_ptr.hbm [resolvable:$true] %s462_s13 }
   0x7   :  { %v32_v11 = vld [vmem:[%s999_s0 + $0x28] sm:$0xff]  ;;  %v33_v12 = vld [vmem:[%s999_s0 + $0x30] sm:$0xff]  ;;  %v34_v13 = vld [vmem:[%s999_s0 + $0x38] sm:$0xff] }
   0x8   :  { %v35_v14 = vld [vmem:[%s999_s0 + $0x40] sm:$0xff]  ;;  %v41_v15 = vld [vmem:[%s999_s0 + $0x70] sm:$0xff]  ;;  %v42_v39 = vld [vmem:[%s999_s0 + $0x78] sm:$0xff]  ;;  %s446_s0 = sshll.u32 %s581_s25, 4  ;;  %s447_s0 = int_to_ptr.vmem [resolvable:$true] %s446_s0 }
   0x9   :  { %v701_v16 = vld [vmem:[%s1001_s2] ss:$0 sm:$0xff]  ;;  %s580_s2 = smov 96   ;;  %v298_v54 = vld [vmem:[%s1002_s3 + $0x18] sm:$0xff]  ;;  %v297_v56 = vld [vmem:[%s1002_s3 + $0x10] sm:$0xff] }
   0xa   :  { %518 = vmatpush.msra.mxu3 %v298_v54  ;;  %343 = vmatpush.msra.mxu1 %v298_v54  ;;  %v296_v57 = vld [vmem:[%s1002_s3 + $0x8] sm:$0xff]  ;;  %v295_v58 = vld [vmem:[%s1002_s3] sm:$0xff]  ;;  %s584_s3 = smov [#allocation4]  }
   0xb   :  { %485 = vmatmul.msk.f32.gmra.mxu0 %vm48_vm0, %v28_v3  ;;  %494 = vmatmul.msk.f32.gmra.mxu2 %vm48_vm0, %v37_v4  ;;  %s460_s7 = sshll.u32 %s584_s3, 4  ;;  %s461_s7 = int_to_ptr.vmem [resolvable:$true] %s460_s7 }
   0xc   :  { %519 = vmatpush.msra.mxu3 %v297_v56  ;;  %344 = vmatpush.msra.mxu1 %v297_v56 }
   0xe   :  { %520 = vmatpush.msra.mxu3 %v296_v57  ;;  %345 = vmatpush.msra.mxu1 %v296_v57 }
  0x10   :  { %521 = vmatpush.msra.mxu3 %v295_v58  ;;  %346 = vmatpush.msra.mxu1 %v295_v58 }
  0x13   :  { %486 = vmatmul.msk.f32.gmra.mxu0 %vm48_vm0, %v29_v5  ;;  %495 = vmatmul.msk.f32.gmra.mxu2 %vm48_vm0, %v38_v6 }
  0x1b   :  { %487 = vmatmul.msk.f32.gmra.mxu0 %vm48_vm0, %v30_v7  ;;  %496 = vmatmul.msk.f32.gmra.mxu2 %vm48_vm0, %v39_v8 }
  0x23   :  { %488 = vmatmul.msk.f32.gmra.mxu0 %vm48_vm0, %v31_v9  ;;  %497 = vmatmul.msk.f32.gmra.mxu2 %vm48_vm0, %v40_v10  ;;  %v413_v10 = vld [vmem:[%s1003_s4] sm:$0xf] }
  0x2b   :  { %489 = vmatmul.msk.f32.gmra.mxu0 %vm48_vm0, %v32_v11  ;;  %498 = vmatmul.msk.f32.gmra.mxu2 %vm48_vm0, %v41_v15 }
  0x33   :  { %490 = vmatmul.msk.f32.gmra.mxu0 %vm48_vm0, %v33_v12  ;;  %499 = vmatmul.msk.f32.gmra.mxu2 %vm48_vm0, %v42_v39 }
  0x3b   :  { %491 = vmatmul.msk.f32.gmra.mxu0 %vm48_vm0, %v34_v13 }
  0x43   :  { %492 = vmatmul.msk.f32.gmra.mxu0 %vm48_vm0, %v35_v14 }
  0x80   :  { %v114_v17 = vpop.f32.mrf.mxu0 }
  0x81   :  { %v115_v18 = vadd.f32 %v701_v16, %v114_v17 }
  0x83   :  { %163 = vst.msk [vmem:[%s1004_s5] sm:$0xff] %vm162_vm1, %v115_v18 }
  0x86   :  { %v141_v19 = vpop.f32.mrf.mxu2 }
  0x87   :  { %v709_v20 = vadd.f32 %v701_v16, %v141_v19 }
  0x88   :  { %v117_v21 = vpop.f32.mrf.mxu0 }
  0x89   :  { %172 = vst.msk [vmem:[%s1004_s5 + $0x48] sm:$0xff] %vm162_vm1, %v709_v20  ;;  %v118_v22 = vadd.f32 %v701_v16, %v117_v21  ;;  %213 = vrot.lane.b32.xlu1 %v709_v20, %s580_s2 }
  0x8b   :  { %164 = vst.msk [vmem:[%s1004_s5 + $0x8] sm:$0xff] %vm162_vm1, %v118_v22 }
  0x8e   :  { %v144_v23 = vpop.f32.mrf.mxu2 }
  0x8f   :  { %v724_v24 = vadd.f32 %v701_v16, %v144_v23 }
  0x90   :  { %v120_v25 = vpop.f32.mrf.mxu0 }
  0x91   :  { %173 = vst.msk [vmem:[%s1004_s5 + $0x50] sm:$0xff] %vm162_vm1, %v724_v24  ;;  %v121_v26 = vadd.f32 %v701_v16, %v120_v25  ;;  %215 = vrot.lane.b32.xlu2 %v724_v24, %s580_s2  ;;  %197 = vrot.lane.b32.xlu1 %v118_v22, %s580_s2 }
  0x93   :  { %165 = vst.msk [vmem:[%s1004_s5 + $0x10] sm:$0xff] %vm162_vm1, %v121_v26 }
  0x96   :  { %v147_v27 = vpop.f32.mrf.mxu2 }
  0x97   :  { %v740_v28 = vadd.f32 %v701_v16, %v147_v27 }
  0x98   :  { %v123_v29 = vpop.f32.mrf.mxu0 }
  0x99   :  { %v124_v30 = vadd.f32 %v701_v16, %v123_v29  ;;  %174 = vst.msk [vmem:[%s1004_s5 + $0x58] sm:$0xff] %vm162_vm1, %v740_v28  ;;  %199 = vrot.lane.b32.xlu2 %v121_v26, %s580_s2 }
  0x9b   :  { %166 = vst.msk [vmem:[%s1004_s5 + $0x18] sm:$0xff] %vm162_vm1, %v124_v30  ;;  %201 = vrot.lane.b32.xlu1 %v124_v30, %s580_s2 }
  0x9e   :  { %v150_v31 = vpop.f32.mrf.mxu2 }
  0x9f   :  { %v755_v32 = vadd.f32 %v701_v16, %v150_v31 }
  0xa0   :  { %v126_v33 = vpop.f32.mrf.mxu0 }
  0xa1   :  { %v127_v34 = vadd.f32 %v701_v16, %v126_v33  ;;  %175 = vst.msk [vmem:[%s1004_s5 + $0x60] sm:$0xff] %vm162_vm1, %v755_v32  ;;  %219 = vrot.lane.b32.xlu2 %v755_v32, %s580_s2 }
  0xa3   :  { %167 = vst.msk [vmem:[%s1004_s5 + $0x20] sm:$0xff] %vm162_vm1, %v127_v34 }
  0xa6   :  { %v153_v35 = vpop.f32.mrf.mxu2 }
  0xa7   :  { %v770_v36 = vadd.f32 %v701_v16, %v153_v35 }
  0xa8   :  { %v129_v37 = vpop.f32.mrf.mxu0 }
  0xa9   :  { %v130_v38 = vadd.f32 %v701_v16, %v129_v37  ;;  %176 = vst.msk [vmem:[%s1004_s5 + $0x68] sm:$0xff] %vm162_vm1, %v770_v36  ;;  %221 = vrot.lane.b32.xlu1 %v770_v36, %s580_s2 }
  0xab   :  { %168 = vst.msk [vmem:[%s1004_s5 + $0x28] sm:$0xff] %vm162_vm1, %v130_v38  ;;  %205 = vrot.lane.b32.xlu2 %v130_v38, %s580_s2 }
  0xae   :  { %v156_v46 = vpop.f32.mrf.mxu2 }
  0xaf   :  { %v808_v47 = vadd.f32 %v701_v16, %v156_v46 }
  0xb0   :  { %v132_v40 = vpop.f32.mrf.mxu0 }
  0xb1   :  { %v133_v41 = vadd.f32 %v701_v16, %v132_v40  ;;  %177 = vst.msk [vmem:[%s1004_s5 + $0x70] sm:$0xff] %vm162_vm1, %v808_v47 }
  0xb3   :  { %169 = vst.msk [vmem:[%s1004_s5 + $0x30] sm:$0xff] %vm162_vm1, %v133_v41  ;;  %207 = vrot.lane.b32.xlu1 %v133_v41, %s580_s2 }
  0xb6   :  { %v159_v61 = vpop.f32.mrf.mxu2 }
  0xb7   :  { %v160_v62 = vadd.f32 %v701_v16, %v159_v61 }
  0xb8   :  { %v135_v42 = vpop.f32.mrf.mxu0 }
  0xb9   :  { %v136_v43 = vadd.f32 %v701_v16, %v135_v42  ;;  %178 = vst.msk [vmem:[%s1004_s5 + $0x78] sm:$0xff] %vm162_vm1, %v160_v62  ;;  %225 = vrot.lane.b32.xlu2 %v160_v62, %s580_s2 }
  0xbb   :  { %170 = vst.msk [vmem:[%s1004_s5 + $0x38] sm:$0xff] %vm162_vm1, %v136_v43 }
  0xc0   :  { %v138_v44 = vpop.f32.mrf.mxu0 }
  0xc1   :  { %v139_v45 = vadd.f32 %v701_v16, %v138_v44 }
  0xc3   :  { %171 = vst.msk [vmem:[%s1004_s5 + $0x40] sm:$0xff] %vm162_vm1, %v139_v45  ;;  %211 = vrot.lane.b32.xlu0 %v139_v45, %s580_s2 }
  0xcb   :  { %195 = vrot.lane.b32.xlu0 %v115_v18, %s580_s2 }
  0xd3   :  { %217 = vrot.lane.b32.xlu0 %v740_v28, %s580_s2 }
  0xdb   :  { %203 = vrot.lane.b32.xlu0 %v127_v34, %s580_s2 }
  0xe3   :  { %223 = vrot.lane.b32.xlu0 %v808_v47, %s580_s2 }
  0xe8   :  { %259 = vxpose.xlu1.b32.start [1/16] (narrow) %v115_v18, 32 }
  0xeb   :  { %v216_v48 = vpop.permute.xlu2 %215  ;;  %209 = vrot.lane.b32.xlu0 %v136_v43, %s580_s2 }
  0xec   :  { %253 = vst.msk [vmem:[%s1005_s6 + $0x50] sm:$0xff] %vm162_vm1, %v216_v48 }
  0xf0   :  { %260 = vxpose.xlu1.b32.cont [2/16] (narrow) %v118_v22, 32 }
  0xf3   :  { %v200_v49 = vpop.permute.xlu2 %199 }
  0xf4   :  { %245 = vst.msk [vmem:[%s1005_s6 + $0x10] sm:$0xff] %vm162_vm1, %v200_v49 }
  0xf8   :  { %261 = vxpose.xlu1.b32.cont [3/16] (narrow) %v121_v26, 32 }
  0xfb   :  { %v214_v50 = vpop.permute.xlu1 %213  ;;  %v220_v51 = vpop.permute.xlu2 %219 }
  0xfc   :  { %252 = vst.msk [vmem:[%s1005_s6 + $0x48] sm:$0xff] %vm162_vm1, %v214_v50 }
  0xfd   :  { %255 = vst.msk [vmem:[%s1005_s6 + $0x60] sm:$0xff] %vm162_vm1, %v220_v51 }
 0x100   :  { %262 = vxpose.xlu1.b32.cont [4/16] (narrow) %v124_v30, 32 }
 0x103   :  { %v198_v52 = vpop.permute.xlu1 %197 }
 0x104   :  { %244 = vst.msk [vmem:[%s1005_s6 + $0x8] sm:$0xff] %vm162_vm1, %v198_v52 }
 0x105   :  { %v206_v53 = vpop.permute.xlu2 %205 }
 0x106   :  { %248 = vst.msk [vmem:[%s1005_s6 + $0x28] sm:$0xff] %vm162_vm1, %v206_v53 }
 0x108   :  { %263 = vxpose.xlu1.b32.cont [5/16] (narrow) %v127_v34, 32 }
 0x10d   :  { %v202_v55 = vpop.permute.xlu1 %201 }
 0x10e   :  { %246 = vst.msk [vmem:[%s1005_s6 + $0x18] sm:$0xff] %vm162_vm1, %v202_v55 }
 0x110   :  { %264 = vxpose.xlu1.b32.cont [6/16] (narrow) %v130_v38, 32 }
 0x113   :  { %v226_v6 = vpop.permute.xlu2 %225 }
 0x114   :  { %258 = vst.msk [vmem:[%s1005_s6 + $0x78] sm:$0xff] %vm162_vm1, %v226_v6 }
 0x118   :  { %265 = vxpose.xlu1.b32.cont [7/16] (narrow) %v133_v41, 32 }
 0x11b   :  { %v222_v59 = vpop.permute.xlu1 %221 }
 0x11c   :  { %256 = vst.msk [vmem:[%s1005_s6 + $0x68] sm:$0xff] %vm162_vm1, %v222_v59 }
 0x120   :  { %266 = vxpose.xlu1.b32.cont [8/16] (narrow) %v136_v43, 32 }
 0x125   :  { %v208_v60 = vpop.permute.xlu1 %207 }
 0x126   :  { %249 = vst.msk [vmem:[%s1005_s6 + $0x30] sm:$0xff] %vm162_vm1, %v208_v60 }
 0x128   :  { %267 = vxpose.xlu1.b32.cont [9/16] (narrow) %v139_v45, 32 }
 0x130   :  { %268 = vxpose.xlu1.b32.cont [10/16] (narrow) %v709_v20, 32 }
 0x135   :  { %v212_v63 = vpop.permute.xlu0 %211 }
 0x136   :  { %251 = vst.msk [vmem:[%s1005_s6 + $0x40] sm:$0xff] %vm162_vm1, %v212_v63  ;;  %508 = vmatmul.msk.f32.vlgmr.msra.gmra.mxu3 %vm162_vm1, %v212_v63 }
 0x138   :  { %269 = vxpose.xlu1.b32.cont [11/16] (narrow) %v724_v24, 32 }
 0x13d   :  { %v196_v0 = vpop.permute.xlu0 %195 }
 0x13e   :  { %243 = vst.msk [vmem:[%s1005_s6] sm:$0xff] %vm162_vm1, %v196_v0  ;;  %500 = vmatmul.msk.f32.vlgmr.msra.gmra.mxu1 %vm162_vm1, %v196_v0  ;;  %509 = vmatmul.msk.f32.gmra.mxu3 %vm162_vm1, %v214_v50 }
 0x140   :  { %270 = vxpose.xlu1.b32.cont [12/16] (narrow) %v740_v28, 32 }
 0x145   :  { %v218_v1 = vpop.permute.xlu0 %217 }
 0x146   :  { %254 = vst.msk [vmem:[%s1005_s6 + $0x58] sm:$0xff] %vm162_vm1, %v218_v1  ;;  %501 = vmatmul.msk.f32.gmra.mxu1 %vm162_vm1, %v198_v52  ;;  %510 = vmatmul.msk.f32.gmra.mxu3 %vm162_vm1, %v216_v48 }
 0x148   :  { %271 = vxpose.xlu1.b32.cont [13/16] (narrow) %v755_v32, 32 }
 0x14d   :  { %v204_v2 = vpop.permute.xlu0 %203 }
 0x14e   :  { %247 = vst.msk [vmem:[%s1005_s6 + $0x20] sm:$0xff] %vm162_vm1, %v204_v2  ;;  %502 = vmatmul.msk.f32.gmra.mxu1 %vm162_vm1, %v200_v49  ;;  %511 = vmatmul.msk.f32.gmra.mxu3 %vm162_vm1, %v218_v1 }
 0x150   :  { %272 = vxpose.xlu1.b32.cont [14/16] (narrow) %v770_v36, 32 }
 0x155   :  { %v224_v3 = vpop.permute.xlu0 %223 }
 0x156   :  { %503 = vmatmul.msk.f32.gmra.mxu1 %vm162_vm1, %v202_v55  ;;  %512 = vmatmul.msk.f32.gmra.mxu3 %vm162_vm1, %v220_v51  ;;  %257 = vst.msk [vmem:[%s1005_s6 + $0x70] sm:$0xff] %vm162_vm1, %v224_v3 }
 0x158   :  { %273 = vxpose.xlu1.b32.cont [15/16] (narrow) %v808_v47, 32 }
 0x15d   :  { %v210_v4 = vpop.permute.xlu0 %209 }
 0x15e   :  { %504 = vmatmul.msk.f32.gmra.mxu1 %vm162_vm1, %v204_v2  ;;  %513 = vmatmul.msk.f32.gmra.mxu3 %vm162_vm1, %v222_v59  ;;  %250 = vst.msk [vmem:[%s1005_s6 + $0x38] sm:$0xff] %vm162_vm1, %v210_v4 }
 0x160   :  { %274 = vxpose.xlu1.b32.end [16/16] (narrow) %v160_v62, 32 }
 0x166   :  { %505 = vmatmul.msk.f32.gmra.mxu1 %vm162_vm1, %v206_v53  ;;  %514 = vmatmul.msk.f32.gmra.mxu3 %vm162_vm1, %v224_v3 }
 0x16e   :  { %506 = vmatmul.msk.f32.gmra.mxu1 %vm162_vm1, %v208_v60  ;;  %515 = vmatmul.msk.f32.gmra.mxu3 %vm162_vm1, %v226_v6 }
 0x176   :  { %507 = vmatmul.msk.f32.gmra.mxu1 %vm162_vm1, %v210_v4 }
 0x18c   :  { %v275_v5 = vpop.trf.xlu1 }
 0x18d   :  { %291 = vst [vmem:[#allocation2] sm:$0xff] %v275_v5 }
 0x194   :  { %v276_v7 = vpop.trf.xlu1 }
 0x195   :  { %292 = vst [vmem:[#allocation2 + $0x8] sm:$0xff] %v276_v7 }
 0x19c   :  { %v277_v8 = vpop.trf.xlu1 }
 0x19d   :  { %293 = vst [vmem:[#allocation2 + $0x10] sm:$0xff] %v277_v8 }
 0x1a4   :  { %v278_v9 = vpop.trf.xlu1 }
 0x1a5   :  { %294 = vst [vmem:[#allocation2 + $0x18] sm:$0xff] %v278_v9  ;;  %429 = vmatpush.msrb.mxu2 %v278_v9 }
 0x1a6   :  { %454 = dma.vmem_to_hbm [thread:$0]  %s447_s0, 512, %s449_s27, [#allocation3], %s582_s28, %s582_s28, %s583_s29  }
 0x1a7   :  { %430 = vmatpush.msrb.mxu2 %v277_v8 }
 0x1a9   :  { %431 = vmatpush.msrb.mxu2 %v276_v7 }
 0x1ab   :  { %432 = vmatpush.msrb.mxu2 %v275_v5 }
 0x1ac   :  { %516 = vmatmul.msk.f32.vlgmr.msrb.gmra.mxu2 %vm162_vm1, %v413_v10 }
 0x1b9   :  { %v372_v11 = vpop.f32.mrf.mxu3 }
 0x1ba   :  { %405 = vst.msk [vmem:[%s1008_s9 + $0x40] sm:$0xff] %vm396_vm2, %v372_v11 }
 0x1bb   :  { %v348_v12 = vpop.f32.mrf.mxu1 }
 0x1bc   :  { %397 = vst.msk [vmem:[%s1008_s9] sm:$0xff] %vm396_vm2, %v348_v12 }
 0x1c1   :  { %v375_v13 = vpop.f32.mrf.mxu3 }
 0x1c2   :  { %406 = vst.msk [vmem:[%s1008_s9 + $0x48] sm:$0xff] %vm396_vm2, %v375_v13 }
 0x1c3   :  { %v351_v14 = vpop.f32.mrf.mxu1 }
 0x1c4   :  { %398 = vst.msk [vmem:[%s1008_s9 + $0x8] sm:$0xff] %vm396_vm2, %v351_v14 }
 0x1c9   :  { %v378_v15 = vpop.f32.mrf.mxu3 }
 0x1ca   :  { %407 = vst.msk [vmem:[%s1008_s9 + $0x50] sm:$0xff] %vm396_vm2, %v378_v15 }
 0x1cb   :  { %v354_v16 = vpop.f32.mrf.mxu1 }
 0x1cc   :  { %399 = vst.msk [vmem:[%s1008_s9 + $0x10] sm:$0xff] %vm396_vm2, %v354_v16 }
 0x1d1   :  { %v381_v17 = vpop.f32.mrf.mxu3 }
 0x1d2   :  { %408 = vst.msk [vmem:[%s1008_s9 + $0x58] sm:$0xff] %vm396_vm2, %v381_v17 }
 0x1d3   :  { %v357_v18 = vpop.f32.mrf.mxu1 }
 0x1d4   :  { %400 = vst.msk [vmem:[%s1008_s9 + $0x18] sm:$0xff] %vm396_vm2, %v357_v18 }
 0x1d9   :  { %v384_v19 = vpop.f32.mrf.mxu3 }
 0x1da   :  { %409 = vst.msk [vmem:[%s1008_s9 + $0x60] sm:$0xff] %vm396_vm2, %v384_v19 }
 0x1db   :  { %v360_v20 = vpop.f32.mrf.mxu1 }
 0x1dc   :  { %401 = vst.msk [vmem:[%s1008_s9 + $0x20] sm:$0xff] %vm396_vm2, %v360_v20 }
 0x1e1   :  { %v387_v21 = vpop.f32.mrf.mxu3 }
 0x1e2   :  { %410 = vst.msk [vmem:[%s1008_s9 + $0x68] sm:$0xff] %vm396_vm2, %v387_v21 }
 0x1e3   :  { %v363_v22 = vpop.f32.mrf.mxu1 }
 0x1e4   :  { %402 = vst.msk [vmem:[%s1008_s9 + $0x28] sm:$0xff] %vm396_vm2, %v363_v22 }
 0x1e9   :  { %v390_v23 = vpop.f32.mrf.mxu3 }
 0x1ea   :  { %411 = vst.msk [vmem:[%s1008_s9 + $0x70] sm:$0xff] %vm396_vm2, %v390_v23 }
 0x1eb   :  { %v366_v24 = vpop.f32.mrf.mxu1 }
 0x1ec   :  { %403 = vst.msk [vmem:[%s1008_s9 + $0x30] sm:$0xff] %vm396_vm2, %v366_v24 }
 0x1f1   :  { %v393_v26 = vpop.f32.mrf.mxu3 }
 0x1f2   :  { %412 = vst.msk [vmem:[%s1008_s9 + $0x78] sm:$0xff] %vm396_vm2, %v393_v26 }
 0x1f3   :  { %v369_v25 = vpop.f32.mrf.mxu1 }
 0x1f4   :  { %404 = vst.msk [vmem:[%s1008_s9 + $0x38] sm:$0xff] %vm396_vm2, %v369_v25 }
 0x22f   :  { %v434_v27 = vpop.f32.mrf.mxu2 }
 0x230   :  { %437 = vst [vmem:[#allocation4] sm:$0xf] %v434_v27 }
 0x231   :  { %465 = dma.vmem_to_hbm [thread:$0]  %s461_s7, 64, %s463_s13, [#allocation5]  }
 0x232   :  { %576 = dma.done.wait [#allocation3], 512  }
 0x233   :  { %577 = vsyncadd [#allocation3], 4294966784 }
 0x234   :  { %578 = dma.done.wait [#allocation5], 64  }
 0x235   :  { %579 = vsyncadd [#allocation5], 4294967232 }
 0x236   :  { %482 = vsyncpa [#allocation3], 1 }
 0x237   :  { %483 = vsyncpa [#allocation5], 1 }

</bundles_post_ra>
